<compile_context>
chip_gen: v7x
topology: tpu7x:2x2x1
jax: 0.10.0
libtpu: 0.0.40
codegen_flags: <defaults>
</compile_context>

<pallas_src>
import functools

import jax
import jax.numpy as jnp
from jax.experimental import pallas as pl
from jax.experimental.pallas import tpu as pltpu


def _round_up(x, m):
    return (x + m - 1) // m * m


# ---------------------------------------------------------------------------
# Fused kernel: h = x; repeat { h = h @ W_i + b_i ; relu (except last layer) }
# refs = (x_ref, w_0, b_0, ..., w_{L-1}, b_{L-1}, o_ref)
# ---------------------------------------------------------------------------
def _fused_mlp_kernel(*refs, num_layers):
    x_ref = refs[0]
    o_ref = refs[1 + 2 * num_layers]
    h = x_ref[...].astype(jnp.float32)
    for i in range(num_layers):                 # unrolled at trace time
        w = refs[1 + 2 * i][...]                # (K_i, N_i), possibly bf16
        b = refs[2 + 2 * i][...].astype(jnp.float32)   # (1, N_i) -> f32 epilogue
        # bf16 x bf16 -> f32 on the MXU (cast only at the MXU boundary).
        h = jnp.dot(h.astype(w.dtype), w, preferred_element_type=jnp.float32) + b
        if i < num_layers - 1:
            h = jnp.maximum(h, 0.0)             # f32 epilogue (v5e-friendly)
    o_ref[...] = h.astype(o_ref.dtype)


# ---------------------------------------------------------------------------
# Parameter handling (done ONCE at setup, not per forward call)
# ---------------------------------------------------------------------------
def init_mlp_params(key, input_dim, hidden_dim, output_dim, num_layers):
    """Deterministic init mimicking torch.nn.Linear's U(-1/sqrt(fan_in), ...)."""
    h = [hidden_dim] * (num_layers - 1)
    dims_in = [input_dim] + h
    dims_out = h + [output_dim]
    params = []
    for n_in, n_out in zip(dims_in, dims_out):
        key, kw, kb = jax.random.split(key, 3)
        bound = 1.0 / jnp.sqrt(jnp.float32(n_in))
        # PyTorch stores weight as (out, in); keep that convention here.
        w = jax.random.uniform(kw, (n_out, n_in), jnp.float32, -bound, bound)
        b = jax.random.uniform(kb, (n_out,), jnp.float32, -bound, bound)
        params.append((w, b))
    return params


def pack_mlp_params(params, param_dtype=jnp.bfloat16):
    """Pre-transpose (out,in)->(in,out), zero-pad ONLY the fused hidden
    interfaces to the 128-lane width, and cast to `param_dtype`.

    Layer 0 keeps its true K (= input_dim) so the input needs no wrapper pad;
    the last layer keeps its true N (= output_dim) so the output needs no
    post-kernel slice.  Padded weight rows / bias lanes are zero, so padded
    activation lanes stay exactly 0 through every layer.
    """
    num_layers = len(params)
    packed = []
    for i, (w, b) in enumerate(params):
        n_out, n_in = w.shape
        kp = n_in if i == 0 else _round_up(n_in, 128)
        np_ = n_out if i == num_layers - 1 else _round_up(n_out, 128)
        w_p = jnp.zeros((kp, np_), jnp.float32).at[:n_in, :n_out].set(w.T)
        b_p = jnp.zeros((1, np_), jnp.float32).at[:, :n_out].set(b)
        packed.append((w_p.astype(param_dtype), b_p.astype(param_dtype)))
    return packed


def _choose_row_tile(M):
    """Largest row tile (cap 1024) that keeps the grid at >= 2 steps so the
    'parallel' row axis can be sharded across v7x's 2 TensorCores."""
    m8 = _round_up(max(M, 1), 8)
    if m8 <= 8:
        return 8
    return min(1024, _round_up(m8 // 2, 8))


# ---------------------------------------------------------------------------
# Forward pass: one fused pallas_call over row tiles
# ---------------------------------------------------------------------------
def mlp_forward(x, packed_params):
    """x: [..., input_dim] -> [..., output_dim]."""
    num_layers = len(packed_params)
    output_dim = packed_params[-1][0].shape[1]
    lead_shape = x.shape[:-1]
    x2d = x.reshape(-1, x.shape[-1])            # free reshape (leading dims)
    M, K = x2d.shape
    assert K == packed_params[0][0].shape[0], "input_dim mismatch with params"

    tm = _choose_row_tile(M)
    grid_m = pl.cdiv(M, tm)                     # ragged last tile is masked

    flat_inputs = [x2d]
    in_specs = [pl.BlockSpec((tm, K), lambda i: (i, 0))]   # streamed row tile
    for w, b in packed_params:
        flat_inputs += [w, b]
        in_specs += [
            pl.BlockSpec(w.shape, lambda i: (0, 0)),  # full weight, resident
            pl.BlockSpec(b.shape, lambda i: (0, 0)),  # bias, resident
        ]

    out = pl.pallas_call(
        functools.partial(_fused_mlp_kernel, num_layers=num_layers),
        out_shape=jax.ShapeDtypeStruct((M, output_dim), x.dtype),
        grid_spec=pltpu.PrefetchScalarGridSpec(
            num_scalar_prefetch=0,
            grid=(grid_m,),
            in_specs=in_specs,
            out_specs=pl.BlockSpec((tm, output_dim), lambda i: (i, 0)),
        ),
        compiler_params=pltpu.CompilerParams(
            dimension_semantics=("parallel",)),
    )(*flat_inputs)

    return out.reshape(*lead_shape, output_dim)


# ---------------------------------------------------------------------------
# Reference (plain JAX) for sanity checking
# ---------------------------------------------------------------------------
def mlp_reference(x, params):
    num_layers = len(params)
    for i, (w, b) in enumerate(params):
        x = x @ w.T + b
        if i < num_layers - 1:
            x = jnp.maximum(x, 0.0)
    return x


if __name__ == "__main__":
    # Shapes consistent with the module's forward:
    # x: [batch=2, seq=8, input_dim=16], hidden_dim=32, output_dim=4, 3 layers.
    input_dim, hidden_dim, output_dim, num_layers = 16, 32, 4, 3
    batch, seq = 2, 8

    key = jax.random.PRNGKey(0)
    key, kx = jax.random.split(key)
    x = jax.random.normal(kx, (batch, seq, input_dim), jnp.float32)

    params = init_mlp_params(key, input_dim, hidden_dim, output_dim, num_layers)
    packed_bf16 = pack_mlp_params(params, jnp.bfloat16)   # default fast path
    packed_f32 = pack_mlp_params(params, jnp.float32)     # full-precision path

    ref = mlp_reference(x, params)

    # bf16-packed path (tolerance relaxed for bf16 MXU inputs, values are O(1)).
    out = jax.block_until_ready(mlp_forward(x, packed_bf16))
    assert out.shape == (batch, seq, output_dim), out.shape
    assert jnp.allclose(out, ref, atol=5e-2, rtol=5e-2), "bf16 path mismatch"

    # f32-packed path (tighter, still allows MXU precision-pass differences).
    out32 = jax.block_until_ready(mlp_forward(x, packed_f32))
    assert jnp.allclose(out32, ref, atol=5e-2, rtol=5e-2), "f32 path mismatch"

    # Larger M: multi-step grid + ragged (masked) last row tile, no padding.
    key, kx2 = jax.random.split(key)
    x_big = jax.random.normal(kx2, (3, 200, input_dim), jnp.float32)  # M=600
    out_big = jax.block_until_ready(mlp_forward(x_big, packed_bf16))
    ref_big = mlp_reference(x_big, params)
    assert out_big.shape == (3, 200, output_dim), out_big.shape
    assert jnp.allclose(out_big, ref_big, atol=5e-2, rtol=5e-2), "big-M mismatch"

    print("KERNEL_OK")
</pallas_src>

<mosaic_0001>
module attributes {stable_mosaic.version = 11 : i64} {
  func.func @_fused_mlp_kernel(%arg0: i32, %arg1: memref<8x16xf32, #tpu.memory_space<vmem>>, %arg2: memref<16x128xbf16, #tpu.memory_space<vmem>>, %arg3: memref<1x128xbf16, #tpu.memory_space<vmem>>, %arg4: memref<128x128xbf16, #tpu.memory_space<vmem>>, %arg5: memref<1x128xbf16, #tpu.memory_space<vmem>>, %arg6: memref<128x4xbf16, #tpu.memory_space<vmem>>, %arg7: memref<1x4xbf16, #tpu.memory_space<vmem>>, %arg8: memref<8x4xf32, #tpu.memory_space<vmem>>) attributes {dimension_semantics = [#tpu.dimension_semantics<parallel>], iteration_bounds = array<i64: 2>, scalar_prefetch = 0 : i64, scratch_operands = 0 : i64, tpu.core_type = #tpu.core_type<tc>, window_params = [{transform_indices = @transform_0, window_bounds = array<i64: 8, 16>}, {pipeline_mode = #tpu.pipeline_mode<synchronous>, transform_indices = @transform_1, window_bounds = array<i64: 16, 128>}, {pipeline_mode = #tpu.pipeline_mode<synchronous>, transform_indices = @transform_2, window_bounds = array<i64: 1, 128>}, {pipeline_mode = #tpu.pipeline_mode<synchronous>, transform_indices = @transform_3, window_bounds = array<i64: 128, 128>}, {pipeline_mode = #tpu.pipeline_mode<synchronous>, transform_indices = @transform_4, window_bounds = array<i64: 1, 128>}, {pipeline_mode = #tpu.pipeline_mode<synchronous>, transform_indices = @transform_5, window_bounds = array<i64: 128, 4>}, {pipeline_mode = #tpu.pipeline_mode<synchronous>, transform_indices = @transform_6, window_bounds = array<i64: 1, 4>}, {transform_indices = @transform_7, window_bounds = array<i64: 8, 4>}]} {
    %c0 = arith.constant 0 : index
    %c0_0 = arith.constant 0 : index
    %0 = vector.load %arg1[%c0, %c0_0] : memref<8x16xf32, #tpu.memory_space<vmem>>, vector<8x16xf32>
    %c0_1 = arith.constant 0 : index
    %c0_2 = arith.constant 0 : index
    %1 = vector.load %arg2[%c0_1, %c0_2] : memref<16x128xbf16, #tpu.memory_space<vmem>>, vector<16x128xbf16>
    %c0_3 = arith.constant 0 : index
    %c0_4 = arith.constant 0 : index
    %2 = vector.load %arg3[%c0_3, %c0_4] : memref<1x128xbf16, #tpu.memory_space<vmem>>, vector<1x128xbf16>
    %3 = arith.extf %2 : vector<1x128xbf16> to vector<1x128xf32>
    %4 = arith.truncf %0 : vector<8x16xf32> to vector<8x16xbf16>
    %cst = arith.constant dense<0.000000e+00> : vector<8x128xf32>
    %5 = tpu.matmul %4, %1, %cst {dimension_numbers = #tpu.dot_dimension_numbers<[1], [0], [0], [1], [0, 0, 1, 1], [], []>} : vector<8x16xbf16>, vector<16x128xbf16>, vector<8x128xf32> -> vector<8x128xf32>
    %6 = vector.broadcast %3 : vector<1x128xf32> to vector<8x128xf32>
    %7 = arith.addf %5, %6 : vector<8x128xf32>
    %cst_5 = arith.constant 0.000000e+00 : f32
    %8 = vector.broadcast %cst_5 : f32 to vector<8x128xf32>
    %9 = arith.maximumf %7, %8 : vector<8x128xf32>
    %c0_6 = arith.constant 0 : index
    %c0_7 = arith.constant 0 : index
    %10 = vector.load %arg4[%c0_6, %c0_7] : memref<128x128xbf16, #tpu.memory_space<vmem>>, vector<128x128xbf16>
    %c0_8 = arith.constant 0 : index
    %c0_9 = arith.constant 0 : index
    %11 = vector.load %arg5[%c0_8, %c0_9] : memref<1x128xbf16, #tpu.memory_space<vmem>>, vector<1x128xbf16>
    %12 = arith.extf %11 : vector<1x128xbf16> to vector<1x128xf32>
    %13 = arith.truncf %9 : vector<8x128xf32> to vector<8x128xbf16>
    %cst_10 = arith.constant dense<0.000000e+00> : vector<8x128xf32>
    %14 = tpu.matmul %13, %10, %cst_10 {dimension_numbers = #tpu.dot_dimension_numbers<[1], [0], [0], [1], [0, 0, 1, 1], [], []>} : vector<8x128xbf16>, vector<128x128xbf16>, vector<8x128xf32> -> vector<8x128xf32>
    %15 = vector.broadcast %12 : vector<1x128xf32> to vector<8x128xf32>
    %16 = arith.addf %14, %15 : vector<8x128xf32>
    %cst_11 = arith.constant 0.000000e+00 : f32
    %17 = vector.broadcast %cst_11 : f32 to vector<8x128xf32>
    %18 = arith.maximumf %16, %17 : vector<8x128xf32>
    %c0_12 = arith.constant 0 : index
    %c0_13 = arith.constant 0 : index
    %19 = vector.load %arg6[%c0_12, %c0_13] : memref<128x4xbf16, #tpu.memory_space<vmem>>, vector<128x4xbf16>
    %c0_14 = arith.constant 0 : index
    %c0_15 = arith.constant 0 : index
    %20 = vector.load %arg7[%c0_14, %c0_15] : memref<1x4xbf16, #tpu.memory_space<vmem>>, vector<1x4xbf16>
    %21 = arith.extf %20 : vector<1x4xbf16> to vector<1x4xf32>
    %22 = arith.truncf %18 : vector<8x128xf32> to vector<8x128xbf16>
    %cst_16 = arith.constant dense<0.000000e+00> : vector<8x4xf32>
    %23 = tpu.matmul %22, %19, %cst_16 {dimension_numbers = #tpu.dot_dimension_numbers<[1], [0], [0], [1], [0, 0, 1, 1], [], []>} : vector<8x128xbf16>, vector<128x4xbf16>, vector<8x4xf32> -> vector<8x4xf32>
    %24 = vector.broadcast %21 : vector<1x4xf32> to vector<8x4xf32>
    %25 = arith.addf %23, %24 : vector<8x4xf32>
    %c0_17 = arith.constant 0 : index
    %c0_18 = arith.constant 0 : index
    %26 = vector.load %arg8[%c0_17, %c0_18] : memref<8x4xf32, #tpu.memory_space<vmem>>, vector<8x4xf32>
    tpu.vector_store %arg8[%c0_17, %c0_18], %25 {strides = array<i32>} : memref<8x4xf32, #tpu.memory_space<vmem>>, vector<8x4xf32>,
    return
  }
  func.func @transform_0(%arg0: i32) -> (i32, i32) {
    %c0_i32 = arith.constant 0 : i32
    %c0_i32_0 = arith.constant 0 : i32
    return %arg0, %c0_i32 : i32, i32
  }
  func.func @transform_1(%arg0: i32) -> (i32, i32) {
    %c0_i32 = arith.constant 0 : i32
    %c0_i32_0 = arith.constant 0 : i32
    %c0_i32_1 = arith.constant 0 : i32
    return %c0_i32, %c0_i32_0 : i32, i32
  }
  func.func @transform_2(%arg0: i32) -> (i32, i32) {
    %c0_i32 = arith.constant 0 : i32
    %c0_i32_0 = arith.constant 0 : i32
    %c0_i32_1 = arith.constant 0 : i32
    return %c0_i32, %c0_i32_0 : i32, i32
  }
  func.func @transform_3(%arg0: i32) -> (i32, i32) {
    %c0_i32 = arith.constant 0 : i32
    %c0_i32_0 = arith.constant 0 : i32
    %c0_i32_1 = arith.constant 0 : i32
    return %c0_i32, %c0_i32_0 : i32, i32
  }
  func.func @transform_4(%arg0: i32) -> (i32, i32) {
    %c0_i32 = arith.constant 0 : i32
    %c0_i32_0 = arith.constant 0 : i32
    %c0_i32_1 = arith.constant 0 : i32
    return %c0_i32, %c0_i32_0 : i32, i32
  }
  func.func @transform_5(%arg0: i32) -> (i32, i32) {
    %c0_i32 = arith.constant 0 : i32
    %c0_i32_0 = arith.constant 0 : i32
    %c0_i32_1 = arith.constant 0 : i32
    return %c0_i32, %c0_i32_0 : i32, i32
  }
  func.func @transform_6(%arg0: i32) -> (i32, i32) {
    %c0_i32 = arith.constant 0 : i32
    %c0_i32_0 = arith.constant 0 : i32
    %c0_i32_1 = arith.constant 0 : i32
    return %c0_i32, %c0_i32_0 : i32, i32
  }
  func.func @transform_7(%arg0: i32) -> (i32, i32) {
    %c0_i32 = arith.constant 0 : i32
    %c0_i32_0 = arith.constant 0 : i32
    return %arg0, %c0_i32 : i32, i32
  }
}

</mosaic_0001>

<bundles_post_ra>
// kernel: tpu_custom_call.1
= control target key start
LH: loop header
LB: loop body
LE: loop exit
PB: predicated region body
PF: predicated region fallthrough
CT: control target
= control target key end

     0   :  { %12 = vsyncpa [#allocation3], 0  ;;  %s1094_s0 = inlined_call_operand.hbm [shape: f32[16,16], index: 0, kind: input, shape index: {}]   ;;  %s1095_s1 = inlined_call_operand.vmem [shape: bf16[16,128], index: 1, kind: input, shape index: {}]   ;;  %s1096_s2 = inlined_call_operand.vmem [shape: bf16[1,128], index: 2, kind: input, shape index: {}]   ;;  %s1097_s3 = inlined_call_operand.vmem [shape: bf16[128,128], index: 3, kind: input, shape index: {}]   ;;  %s1098_s4 = inlined_call_operand.vmem [shape: bf16[1,128], index: 4, kind: input, shape index: {}]   ;;  %s1099_s5 = inlined_call_operand.vmem [shape: bf16[128,4], index: 5, kind: input, shape index: {}]   ;;  %s1100_s6 = inlined_call_operand.vmem [shape: bf16[1,4], index: 6, kind: input, shape index: {}]   ;;  %s1101_s7 = inlined_call_operand.vmem [shape: f32[16,4], index: 7, kind: output, shape index: {}]  }
   0x1   :  { %14 = vsyncpa [#allocation3 + $0x1], 0  ;;  %s907_s24 = smov 0   ;;  %s909_s25 = smov 0  }
   0x2   :  { %s911_s26 = smov 0   ;;  %s913_s27 = smov 0  }
   0x3 LB: > { %s926_s28 = sadd.s32 4294967295, %s862_s27   ;;  %s929_s29 = sadd.s32 1, %s862_s27   ;;  %s862_s27 = sphi %s913_s27, %s1109_s27   ;;  %s858_s26 = sphi %s911_s26, %s1108_s26   ;;  %s854_s25 = sphi %s909_s25, %s1107_s25   ;;  %s850_s24 = sphi %s907_s24, %s1106_s24  }
   0x4   : > { %s24_s30 = ssub.s32 %s862_s27, %s929_s29  ;;  %s27_s8 = sadd.s32 1, %s858_s26 }
   0x5   : > { %p25_p0 = scmp.eq.s32.totalorder %s24_s30, 0  ;;  %p34_p1 = scmp.ne.s32.totalorder %s858_s26, %s854_s25 }
   0x6   : > { %p35_p2 = scmp.eq.s32.totalorder %s862_s27, 0  ;;  %p40_p3 = scmp.ne.s32.totalorder %s854_s25, %s850_s24 }
   0x7   : > { %s939_s9 = scalar_select %p25_p0, %s858_s26, %s27_s8  }
   0x8   : > { %p36_p4 = por %p35_p2, %p34_p1  ;;  %p41_p5 = scmp.eq.s32.totalorder %s926_s28, 0 }
   0x9   : > { %p746_p6 = scmp.lt.s32.totalorder %s862_s27, 2  ;;  %s234_s11 = sand.u32 1, %s858_s26  }
   0xa   : > { %p943_p7 = por %p41_p5, %p40_p3  ;;  %s649_s12 = sshll.u32 %s234_s11, 3 }
   0xb   : > { %s650_s13 = sshll.u32 %s862_s27, 7  ;;  %s238_s17 = scalar_lea.vmem [#allocation2], %s649_s12 }
   0xc   : > { %s952_s16 = scalar_lea.hbm %s1094_s0, %s650_s13  ;;  %s245_s18 = sshll.u32 %s238_s17, 4  ;;  %s954_s18 = int_to_ptr.vmem [resolvable:$true] %s245_s18 }
   0xd   : > { %p956_p8 = pnand %p746_p6, %p36_p4  ;;  %s235_s20 = scalar_lea.sflag [#allocation3], %s234_s11 }
   0xe   : > { %s798_s21 = scalar_lea.hbm %s952_s16, 128  ;;  %s803_s24 = scalar_lea.hbm %s1094_s0, 256 }
   0xf   : > { %p799_p11 = scmp.ne.s32.totalorder %s952_s16, %s798_s21  ;;  %p800_p12 = pneg %p956_p8 }
  0x10   : > { %p804_p1 = scmp.lt.u32.totalorder %s952_s16, %s1094_s0  ;;  %p805_p2 = scmp.lt.u32.totalorder %s803_s24, %s798_s21 }
  0x11   : > { %p801_p13 = pnand %p800_p12, %p799_p11  ;;  %p807_p4 = scmp.lt.u32.totalorder %s798_s21, %s952_s16 }
  0x12   : > { %p806_p3 = por %p805_p2, %p804_p1 }
  0x13   : > { %p802_p0 = pneg %p801_p13 }
  0x14   : > { %p808_p5 = por %p807_p4, %p806_p3 }
  0x16   : > { %p809_p6 = pnand %p808_p5, %p802_p0 }
  0x18   : > { %812 = shalt.err (!%p809_p6)
}
  0x19   : > { %s813_s11 = scalar_lea.vmem %s954_s18, 128  ;;  %s864_s12 = smov [#allocation2]  }
  0x1a   : > { %p814_p11 = scmp.ne.s32.totalorder %s954_s18, %s813_s11  ;;  %s818_s13 = sshll.u32 %s864_s12, 4  ;;  %s819_s13 = int_to_ptr.vmem [resolvable:$false] %s818_s13 }
  0x1b   : > { %s820_s14 = scalar_lea.vmem %s819_s13, 256  ;;  %p821_p10 = scmp.lt.s32.totalorder %s954_s18, %s819_s13 }
  0x1c   : > { %p816_p13 = pnand %p814_p11, %p800_p12  ;;  %p822_p1 = scmp.lt.s32.totalorder %s820_s14, %s813_s11 }
  0x1e   : > { %p817_p9 = pneg %p816_p13  ;;  %p823_p2 = por %p822_p1, %p821_p10 }
  0x20   : > { %p824_p3 = pnand %p823_p2, %p817_p9 }
  0x22   : > { %827 = shalt.err (!%p824_p3)
}
  0x23   : > { %745 = dma.hbm_to_vmem [thread:$0]  (!%p956_p8), %s952_s16, 128, %s954_s18, %s235_s20  }
  0x24   : > { %p1104_p0 = scmp.lt.s32.totalorder %s862_s27, 3  ;;  %p1105_p4 = scmp.ge.s32.totalorder %s862_s27, 1 }
  0x26   : > { %p251_p12 = pnand %p1105_p4, %p1104_p0 }
  0x27   : > { %s256_s15 = sand.u32 (!%p251_p12), 1, %s854_s25  }
  0x28   : > { %254 = sbr.rel (%p251_p12) target bundleno = 705 (0x2c1), region = 48  ;;  %s652_s17 = sshll.u32 (!%p251_p12), %s256_s15, 3 }
  0x29   : > { %s257_s21 = scalar_lea.sflag (!%p251_p12), [#allocation3], %s256_s15  ;;  %s260_s22 = scalar_lea.vmem (!%p251_p12), [#allocation2], %s652_s17 }
  0x2f   : > { %845 = dma.done.wait (%p943_p7), %s257_s21, 128  }
  0x30   : > { %847 = vsyncadd (%p943_p7), %s257_s21, 4294967168  ;;  %v865_v0 = vmov 0.0   ;;  %vm866_vm0 = vmmov 0   ;;  %v781_v1 = vld [vmem:[%s1095_s1] sm:$0xff]   ;;  %vm311_vm1 = vcmask 130048   ;;  %v783_v5 = vld [vmem:[%s1097_s3 + $0x8] sm:$0xff]   ;;  %v301_v18 = vlaneseq }
  0x31   : > { %694 = vmatprep.subr.bf16.mxu0 %v865_v0  ;;  %696 = vmatprep.mubr.msk.bf16.mxu0 %vm866_vm0, %v865_v0  ;;  %v295_v2 = vld [vmem:[%s260_s22] sm:$0xff]  ;;  %v784_v6 = vld [vmem:[%s1097_s3 + $0x10] sm:$0xff]   ;;  %v785_v7 = vld [vmem:[%s1097_s3 + $0x18] sm:$0xff]   ;;  %p290_p7 = scmp.lt.s32.totalorder %s926_s28, 1  ;;  %vm579_vm2 = vcmask 31744  }
  0x32   : > { %700 = vmatprep.subr.bf16.mxu1 %v865_v0  ;;  %716 = vmatprep.mubr.msk.bf16.mxu1 %vm866_vm0, %v865_v0  ;;  %v300_v3 = vpack.c.bf16 %v295_v2, %v295_v2  ;;  %v782_v4 = vld [vmem:[%s1097_s3] sm:$0xff]   ;;  %v787_v9 = vld [vmem:[%s1097_s3 + $0x28] sm:$0xff]   ;;  %v788_v10 = vld [vmem:[%s1097_s3 + $0x30] sm:$0xff]   ;;  %v302_v19 = vshrl.u32 %v301_v18, 7 }
  0x33   : > { %695 = vmatpush3.bf16.msra.mxu0 %v781_v1  ;;  %701 = vmatpush3.bf16.msra.mxu1 %v782_v4  ;;  %v786_v8 = vld [vmem:[%s1097_s3 + $0x20] sm:$0xff]   ;;  %v789_v11 = vld [vmem:[%s1097_s3 + $0x38] sm:$0xff]   ;;  %v791_v13 = vld [vmem:[%s1099_s5 + $0x8] sm:$0xff]   ;;  %s1111_s28 = smov (!%p290_p7, %s926_s28), 1 }
  0x34   : > { %720 = vmatprep.subr.bf16.mxu0 %v865_v0  ;;  %702 = vmatprep.subr.bf16.mxu1 %v865_v0  ;;  %v790_v12 = vld [vmem:[%s1099_s5] sm:$0xff]   ;;  %v792_v14 = vld [vmem:[%s1099_s5 + $0x10] sm:$0xff]   ;;  %v793_v15 = vld [vmem:[%s1099_s5 + $0x18] sm:$0xff]   ;;  %v303_v22 = vsub.s32 0, %v302_v19  ;;  %s653_s19 = sshll.u32 %s1111_s28, 3 }
  0x35   : > { %v794_v16 = vld [vmem:[%s1099_s5 + $0x20] sm:$0xff]   ;;  %v795_v17 = vld [vmem:[%s1099_s5 + $0x28] sm:$0xff]   ;;  %v796_v31 = vld [vmem:[%s1099_s5 + $0x30] sm:$0xff]   ;;  %s293_s24 = scalar_lea.vmem %s1101_s7, %s653_s19 }
  0x36   : > { %697 = vmatmul.mubr.msk.bf16.vlgmr.msra.gmra.mrb[0].mxu0 %vm311_vm1, %v300_v3  ;;  %v298_v20 = vld [vmem:[%s1096_s2] sm:$0x1]  ;;  %v797_v32 = vld [vmem:[%s1099_s5 + $0x38] sm:$0xff]  }
  0x37   : > { %736 = vmatprep.mubr.msk.bf16.mxu0 %vm866_vm0, %v865_v0  ;;  %703 = vmatpush3.bf16.msra.mxu1 %v783_v5  ;;  %v299_v21 = vunpack.c.l.bf16 %v298_v20  ;;  %v372_v33 = vld [vmem:[%s1098_s4] sm:$0x1] }
  0x38   : > { %704 = vmatprep.subr.bf16.mxu1 %v865_v0  ;;  %721 = vmatpush3.bf16.msra.mxu0 %v790_v12  ;;  %v373_v34 = vunpack.c.l.bf16 %v372_v33  ;;  %v484_v43 = vld [vmem:[%s1100_s6] sm:$0x1] }
  0x39   : > { %722 = vmatprep.subr.bf16.mxu0 %v865_v0  ;;  %v304_v23 = vrot.slane %v299_v21, %v303_v22  ;;  %v485_v44 = vunpack.c.l.bf16 %v484_v43 }
  0x3a   : > { %v378_v35 = vrot.slane %v373_v34, %v303_v22 }
  0x3b   : > { %705 = vmatpush3.bf16.msra.mxu1 %v784_v6  ;;  %v490_v45 = vrot.slane %v485_v44, %v303_v22 }
  0x3c   : > { %706 = vmatprep.subr.bf16.mxu1 %v865_v0  ;;  %723 = vmatpush3.bf16.msra.mxu0 %v791_v13 }
  0x3d   : > { %724 = vmatprep.subr.bf16.mxu0 %v865_v0 }
  0x3f   : > { %707 = vmatpush3.bf16.msra.mxu1 %v785_v7 }
  0x40   : > { %708 = vmatprep.subr.bf16.mxu1 %v865_v0  ;;  %725 = vmatpush3.bf16.msra.mxu0 %v792_v14 }
  0x41   : > { %726 = vmatprep.subr.bf16.mxu0 %v865_v0 }
  0x43   : > { %709 = vmatpush3.bf16.msra.mxu1 %v786_v8 }
  0x44   : > { %710 = vmatprep.subr.bf16.mxu1 %v865_v0  ;;  %727 = vmatpush3.bf16.msra.mxu0 %v793_v15 }
  0x45   : > { %728 = vmatprep.subr.bf16.mxu0 %v865_v0 }
  0x47   : > { %711 = vmatpush3.bf16.msra.mxu1 %v787_v9 }
  0x48   : > { %712 = vmatprep.subr.bf16.mxu1 %v865_v0  ;;  %729 = vmatpush3.bf16.msra.mxu0 %v794_v16 }
  0x49   : > { %730 = vmatprep.subr.bf16.mxu0 %v865_v0 }
  0x4b   : > { %713 = vmatpush3.bf16.msra.mxu1 %v788_v10 }
  0x4c   : > { %714 = vmatprep.subr.bf16.mxu1 %v865_v0  ;;  %731 = vmatpush3.bf16.msra.mxu0 %v795_v17 }
  0x4d   : > { %732 = vmatprep.subr.bf16.mxu0 %v865_v0 }
  0x4f   : > { %715 = vmatpush3.bf16.msra.mxu1 %v789_v11 }
  0x50   : > { %733 = vmatpush3.bf16.msra.mxu0 %v796_v31 }
  0x51   : > { %734 = vmatprep.subr.bf16.mxu0 %v865_v0 }
  0x54   : > { %735 = vmatpush3.bf16.msra.mxu0 %v797_v32 }
 0x109   : > { %v349_v24 = vpop.f32.mrb[0].mxu0 }
 0x10a   : > { %v350_v25 = vadd.f32 %v349_v24, %v304_v23  ;;  %v698_v26 = vpop.f32.mrb[1].mxu0 }
 0x10b   : > { %v352_v27 = vpop.f32.mrb[2].mxu0 }
 0x10c   : > { %v355_v28 = vmax.f32 %v350_v25, 0.0  ;;  %v699_v29 = vpop.f32.mrb[3].mxu0 }
 0x10e   : > { %v374_v30 = vpack.c.bf16 %v355_v28, %v355_v28 }
 0x110   : > { %717 = vmatmul.mubr.bf16.vlgmr.msra.gmra.mrb[0].mxu1 %v374_v30 }
 0x1e3   : > { %v461_v36 = vpop.f32.mrb[0].mxu1 }
 0x1e4   : > { %v462_v37 = vadd.f32 %v461_v36, %v378_v35  ;;  %v718_v38 = vpop.f32.mrb[1].mxu1 }
 0x1e5   : > { %v464_v39 = vpop.f32.mrb[2].mxu1 }
 0x1e6   : > { %v467_v40 = vmax.f32 %v462_v37, 0.0  ;;  %v719_v41 = vpop.f32.mrb[3].mxu1 }
 0x1e8   : > { %v486_v42 = vpack.c.bf16 %v467_v40, %v467_v40 }
 0x1ea   : > { %737 = vmatmul.mubr.bf16.vlgmr.msra.gmra.mrb[4].mxu0 %v486_v42 }
 0x2bd   : > { %v573_v46 = vpop.f32.mrb[4].mxu0 }
 0x2be   : > { %v574_v47 = vadd.f32 %v573_v46, %v490_v45  ;;  %v738_v48 = vpop.f32.mrb[5].mxu0 }
 0x2bf   : > { %v576_v49 = vpop.f32.mrb[6].mxu0 }
 0x2c0   : > { %580 = vst.msk [vmem:[%s293_s24] sm:$0xff] %vm579_vm2, %v574_v47  ;;  %v739_v50 = vpop.f32.mrb[7].mxu0 }
 0x2c1 PF: > { %p17_p8 = scmp.ge.s32.totalorder %s929_s29, 4   ;;  %s1106_s24 = smov %s854_s25 }
 0x2c2   : > { %s1107_s25 = smov %s858_s26  ;;  %s1108_s26 = smov %s939_s9 }
 0x2c3   : > { %s1109_s27 = smov %s929_s29  ;;  %19 = sbr.rel (!%p17_p8) target bundleno = 3 (0x3), region = 88 }
 0x2ca   :  { %600 = vsyncpa [#allocation3], 1 }
 0x2cb   :  { %602 = vsyncpa [#allocation3 + $0x1], 1 }

</bundles_post_ra>
